<compile_context>
chip_gen: v6e
topology: v6e:2x2x1
jax: 0.10.0
libtpu: 0.0.40
codegen_flags: <defaults>
</compile_context>

<pallas_src>
import functools

import jax
import jax.numpy as jnp
from jax import lax
from jax.experimental import pallas as pl
from jax.experimental.pallas import tpu as pltpu

_ROW_CHUNK = 64  # rows per inner chunk: keeps live vregs in the rank loop <64


def _round_up(a, b):
    return -(-a // b) * b


def _memory_read_kernel(q_ref, keys_ref, normal_ref, abnormal_ref, *,
                        row_chunk):
    keys = keys_ref[...]                           # (M, D) f32, resident
    m = keys.shape[0]
    tn = q_ref.shape[0]
    rc = row_chunk
    n_chunks = tn // rc

    col_ids = lax.broadcasted_iota(jnp.int32, (rc, m), 1)

    def chunk_body(c, carry):
        r0 = pl.multiple_of(c * rc, rc)
        q = q_ref[pl.ds(r0, rc), :]                # (RC, D)

        # score = q . keys^T: contract dim 1 of both operands (no
        # materialized transpose / relayout).
        score = lax.dot_general(
            q, keys,
            dimension_numbers=(((1,), (1,)), ((), ())),
            preferred_element_type=jnp.float32)    # (RC, M)

        # Descending rank of every score within its row:
        #   rank_j = #{k : s_k > s_j or (s_k == s_j and k < j)}
        # (ties -> lowest index first, matching a stable descending sort).
        # Pure VPU compares on <=8-vreg operands; no serial chain of
        # cross-lane reductions, no spills at RC=64.  Raw scores give the
        # same ordering as the softmax (monotone), so the approximate
        # reciprocals below cannot perturb the selection.
        rank = jnp.zeros((rc, m), jnp.int32)
        for k in range(m):                         # m = memory_size, small
            sk = score[:, k:k + 1]                 # (RC, 1) static lane slice
            beats = (sk > score) | ((sk == score) & (col_ids > k))
            rank = rank + beats.astype(jnp.int32)
        top_mask = rank < 5                        # 5 largest scores
        bot_mask = (rank >= 5) & (rank < 10)       # next 5

        # Row softmax over the memory axis (softmax_score_memory); divides go
        # to the otherwise idle EUP via approximate reciprocal.
        score = score - jnp.max(score, axis=1, keepdims=True)
        e = jnp.exp(score)                         # in (0, 1]
        s = e * pl.reciprocal(jnp.sum(e, axis=1, keepdims=True), approx=True)

        # Re-softmax of the selected softmax scores (temperature 1).  s <= 1
        # so exp needs no max subtraction.  The 0.5 / 0.99 blend scales are
        # folded into the normalizing reciprocals (saves one (RC, D) multiply
        # per output).
        es = jnp.exp(s)
        w_top = jnp.where(top_mask, es, 0.0)
        w_bot = jnp.where(bot_mask, es, 0.0)
        w_top = w_top * (0.5 * pl.reciprocal(
            jnp.sum(w_top, axis=1, keepdims=True), approx=True))
        w_bot = w_bot * (0.99 * pl.reciprocal(
            jnp.sum(w_bot, axis=1, keepdims=True), approx=True))

        # Two standard (RC, M) @ (M, D) MXU calls against the resident keys;
        # no concat / result-slice relayout copies.
        top_out = jnp.dot(w_top, keys, preferred_element_type=jnp.float32)
        bot_out = jnp.dot(w_bot, keys, preferred_element_type=jnp.float32)

        # Epilogue: exactly two fused blend+store statements (v5e has a
        # single vector-store slot).
        normal_ref[pl.ds(r0, rc), :] = 0.5 * q + top_out
        abnormal_ref[pl.ds(r0, rc), :] = 0.01 * q + bot_out
        return carry

    lax.fori_loop(0, n_chunks, chunk_body, 0)


def conv_ae_forward(x, m_items, *, block_rows=512):
    """Pallas implementation of convAE.forward: returns (normal, abnormal, x)."""
    N, D = x.shape
    M, Dk = m_items.shape
    assert D == Dk
    assert M >= 10, "memory_size must be >= 10 (top-5 + next-5 selection)"

    xf = x.astype(jnp.float32)
    keys = m_items.astype(jnp.float32)

    # Row tile selection:
    #  * multiple of 8 sublanes;
    #  * target ceil(N/2) so any N >= 16 gives >= 2 "parallel" grid steps
    #    (both v7x TensorCores busy);
    #  * capped at block_rows (512: ~85% of HBM roofline territory on v6e)
    #    and at a VMEM budget: double-buffered q + two outputs is
    #    6*TN*D*4 B, kept under ~20 MiB so the default 32 MiB scoped VMEM
    #    works on every generation including v7x (64 MiB physical).
    # The feature dim is NOT padded: a full-extent last block dim satisfies
    # the (8,128) rule for any D, so no extra HBM traffic for small key_dim.
    half_rows = _round_up(max(-(-N // 2), 1), 8)
    vmem_rows = max(_ROW_CHUNK, ((20 << 20) // (24 * D)) // 8 * 8)
    tn = min(half_rows, block_rows, vmem_rows)
    if tn > _ROW_CHUNK:
        tn = _round_up(tn, _ROW_CHUNK)     # inner chunk loop needs TN % RC == 0
    rc = min(tn, _ROW_CHUNK)

    np_rows = _round_up(N, tn)
    xp = xf if np_rows == N else (
        jnp.zeros((np_rows, D), jnp.float32).at[:N].set(xf))

    kernel = functools.partial(_memory_read_kernel, row_chunk=rc)

    normal, abnormal = pl.pallas_call(
        kernel,
        grid=(np_rows // tn,),
        out_shape=(
            jax.ShapeDtypeStruct((np_rows, D), jnp.float32),
            jax.ShapeDtypeStruct((np_rows, D), jnp.float32),
        ),
        in_specs=[
            pl.BlockSpec((tn, D), lambda i: (i, 0)),   # q row tile
            pl.BlockSpec((M, D), lambda i: (0, 0)),    # keys resident block
        ],
        out_specs=(
            pl.BlockSpec((tn, D), lambda i: (i, 0)),
            pl.BlockSpec((tn, D), lambda i: (i, 0)),
        ),
        compiler_params=pltpu.CompilerParams(
            dimension_semantics=("parallel",)),
    )(xp, keys)

    if np_rows != N:
        normal, abnormal = normal[:N], abnormal[:N]
    return normal, abnormal, x


def _ref_forward(x, keys):
    """Pure-JAX reference mirroring the PyTorch Memory.read semantics."""
    score = x @ keys.T
    s = jax.nn.softmax(score, axis=1)
    order = jnp.argsort(-s, axis=1)          # stable: ties -> lowest index
    top_idx, bot_idx = order[:, :5], order[:, 5:10]

    def weighted(idx):
        sel = jnp.take_along_axis(s, idx, axis=1)
        w = jax.nn.softmax(sel, axis=1)
        return jnp.einsum('nk,nkd->nd', w, keys[idx])

    top, bot = weighted(top_idx), weighted(bot_idx)
    return 0.5 * x + 0.5 * top, 0.01 * x + 0.99 * bot


if __name__ == "__main__":
    # Module hyperparameters (convAE(encoded_dim, key_dim, memory_size)).
    memory_size = 16
    key_dim = 32
    batch = 8

    key = jax.random.PRNGKey(0)
    k_items, k_x = jax.random.split(key)

    # m_items = F.normalize(torch.rand(memory_size, key_dim), dim=1)
    m_raw = jax.random.uniform(k_items, (memory_size, key_dim),
                               dtype=jnp.float32)
    m_items = m_raw / jnp.linalg.norm(m_raw, axis=1, keepdims=True)

    # Query features (flattened encoded features in the original pipeline).
    x = jax.random.normal(k_x, (batch, key_dim), dtype=jnp.float32)

    normal, abnormal, x_out = conv_ae_forward(x, m_items)
    jax.block_until_ready((normal, abnormal, x_out))

    ref_normal, ref_abnormal = _ref_forward(x, m_items)
    # Tolerance accounts for pl.reciprocal(approx=True) in the softmax
    # normalizations (the top-k selection itself is exact: it ranks raw
    # scores, untouched by the approximate reciprocals).
    assert jnp.allclose(normal, ref_normal, atol=5e-3, rtol=5e-3)
    assert jnp.allclose(abnormal, ref_abnormal, atol=5e-3, rtol=5e-3)
    assert jnp.array_equal(x_out, x)

    # TODO(synk): the PyTorch module also appends selected indices to
    # state/indices/{top,bottom}_indices.txt — host file I/O side effect, omitted.
    print("KERNEL_OK")
</pallas_src>

<mosaic_0001>
module attributes {stable_mosaic.version = 11 : i64} {
  func.func @_memory_read_kernel(%arg0: i32, %arg1: memref<8x32xf32, #tpu.memory_space<vmem>>, %arg2: memref<16x32xf32, #tpu.memory_space<vmem>>, %arg3: memref<8x32xf32, #tpu.memory_space<vmem>>, %arg4: memref<8x32xf32, #tpu.memory_space<vmem>>) attributes {dimension_semantics = [#tpu.dimension_semantics<parallel>], iteration_bounds = array<i64: 1>, scalar_prefetch = 0 : i64, scratch_operands = 0 : i64, tpu.core_type = #tpu.core_type<tc>, window_params = [{transform_indices = @transform_0, window_bounds = array<i64: 8, 32>}, {pipeline_mode = #tpu.pipeline_mode<synchronous>, transform_indices = @transform_1, window_bounds = array<i64: 16, 32>}, {transform_indices = @transform_2, window_bounds = array<i64: 8, 32>}, {transform_indices = @transform_3, window_bounds = array<i64: 8, 32>}]} {
    %c0 = arith.constant 0 : index
    %c0_0 = arith.constant 0 : index
    %0 = vector.load %arg2[%c0, %c0_0] : memref<16x32xf32, #tpu.memory_space<vmem>>, vector<16x32xf32>
    %1 = tpu.iota {dimensions = array<i32: 1>} : vector<8x16xi32>
    %c0_i32 = arith.constant 0 : i32
    %c8_i32 = arith.constant 8 : i32
    %2 = arith.muli %c0_i32, %c8_i32 : i32
    %3 = tpu.assume_multiple %2, 8 : i32
    %4 = arith.index_cast %3 : i32 to index
    %c0_1 = arith.constant 0 : index
    %5 = vector.load %arg1[%4, %c0_1] : memref<8x32xf32, #tpu.memory_space<vmem>>, vector<8x32xf32>
    %cst = arith.constant dense<0.000000e+00> : vector<8x16xf32>
    %6 = tpu.matmul %5, %0, %cst {dimension_numbers = #tpu.dot_dimension_numbers<[1], [1], [0], [0], [0, 0, 1, 0], [], []>} : vector<8x32xf32>, vector<16x32xf32>, vector<8x16xf32> -> vector<8x16xf32>
    %c0_i32_2 = arith.constant 0 : i32
    %7 = vector.broadcast %c0_i32_2 : i32 to vector<8x16xi32>
    %8 = vector.extract_strided_slice %6 {offsets = [0, 0], sizes = [8, 1], strides = [1, 1]} : vector<8x16xf32> to vector<8x1xf32>
    %9 = vector.broadcast %8 : vector<8x1xf32> to vector<8x16xf32>
    %10 = arith.cmpf ogt, %9, %6 : vector<8x16xf32>
    %11 = vector.broadcast %8 : vector<8x1xf32> to vector<8x16xf32>
    %12 = arith.cmpf oeq, %11, %6 : vector<8x16xf32>
    %c0_i32_3 = arith.constant 0 : i32
    %13 = vector.broadcast %c0_i32_3 : i32 to vector<8x16xi32>
    %14 = arith.cmpi sgt, %1, %13 : vector<8x16xi32>
    %15 = arith.andi %12, %14 : vector<8x16xi1>
    %16 = arith.ori %10, %15 : vector<8x16xi1>
    %17 = arith.extui %16 : vector<8x16xi1> to vector<8x16xi32>
    %18 = arith.addi %7, %17 : vector<8x16xi32>
    %19 = vector.extract_strided_slice %6 {offsets = [0, 1], sizes = [8, 1], strides = [1, 1]} : vector<8x16xf32> to vector<8x1xf32>
    %20 = vector.broadcast %19 : vector<8x1xf32> to vector<8x16xf32>
    %21 = arith.cmpf ogt, %20, %6 : vector<8x16xf32>
    %22 = vector.broadcast %19 : vector<8x1xf32> to vector<8x16xf32>
    %23 = arith.cmpf oeq, %22, %6 : vector<8x16xf32>
    %c1_i32 = arith.constant 1 : i32
    %24 = vector.broadcast %c1_i32 : i32 to vector<8x16xi32>
    %25 = arith.cmpi sgt, %1, %24 : vector<8x16xi32>
    %26 = arith.andi %23, %25 : vector<8x16xi1>
    %27 = arith.ori %21, %26 : vector<8x16xi1>
    %28 = arith.extui %27 : vector<8x16xi1> to vector<8x16xi32>
    %29 = arith.addi %18, %28 : vector<8x16xi32>
    %30 = vector.extract_strided_slice %6 {offsets = [0, 2], sizes = [8, 1], strides = [1, 1]} : vector<8x16xf32> to vector<8x1xf32>
    %31 = vector.broadcast %30 : vector<8x1xf32> to vector<8x16xf32>
    %32 = arith.cmpf ogt, %31, %6 : vector<8x16xf32>
    %33 = vector.broadcast %30 : vector<8x1xf32> to vector<8x16xf32>
    %34 = arith.cmpf oeq, %33, %6 : vector<8x16xf32>
    %c2_i32 = arith.constant 2 : i32
    %35 = vector.broadcast %c2_i32 : i32 to vector<8x16xi32>
    %36 = arith.cmpi sgt, %1, %35 : vector<8x16xi32>
    %37 = arith.andi %34, %36 : vector<8x16xi1>
    %38 = arith.ori %32, %37 : vector<8x16xi1>
    %39 = arith.extui %38 : vector<8x16xi1> to vector<8x16xi32>
    %40 = arith.addi %29, %39 : vector<8x16xi32>
    %41 = vector.extract_strided_slice %6 {offsets = [0, 3], sizes = [8, 1], strides = [1, 1]} : vector<8x16xf32> to vector<8x1xf32>
    %42 = vector.broadcast %41 : vector<8x1xf32> to vector<8x16xf32>
    %43 = arith.cmpf ogt, %42, %6 : vector<8x16xf32>
    %44 = vector.broadcast %41 : vector<8x1xf32> to vector<8x16xf32>
    %45 = arith.cmpf oeq, %44, %6 : vector<8x16xf32>
    %c3_i32 = arith.constant 3 : i32
    %46 = vector.broadcast %c3_i32 : i32 to vector<8x16xi32>
    %47 = arith.cmpi sgt, %1, %46 : vector<8x16xi32>
    %48 = arith.andi %45, %47 : vector<8x16xi1>
    %49 = arith.ori %43, %48 : vector<8x16xi1>
    %50 = arith.extui %49 : vector<8x16xi1> to vector<8x16xi32>
    %51 = arith.addi %40, %50 : vector<8x16xi32>
    %52 = vector.extract_strided_slice %6 {offsets = [0, 4], sizes = [8, 1], strides = [1, 1]} : vector<8x16xf32> to vector<8x1xf32>
    %53 = vector.broadcast %52 : vector<8x1xf32> to vector<8x16xf32>
    %54 = arith.cmpf ogt, %53, %6 : vector<8x16xf32>
    %55 = vector.broadcast %52 : vector<8x1xf32> to vector<8x16xf32>
    %56 = arith.cmpf oeq, %55, %6 : vector<8x16xf32>
    %c4_i32 = arith.constant 4 : i32
    %57 = vector.broadcast %c4_i32 : i32 to vector<8x16xi32>
    %58 = arith.cmpi sgt, %1, %57 : vector<8x16xi32>
    %59 = arith.andi %56, %58 : vector<8x16xi1>
    %60 = arith.ori %54, %59 : vector<8x16xi1>
    %61 = arith.extui %60 : vector<8x16xi1> to vector<8x16xi32>
    %62 = arith.addi %51, %61 : vector<8x16xi32>
    %63 = vector.extract_strided_slice %6 {offsets = [0, 5], sizes = [8, 1], strides = [1, 1]} : vector<8x16xf32> to vector<8x1xf32>
    %64 = vector.broadcast %63 : vector<8x1xf32> to vector<8x16xf32>
    %65 = arith.cmpf ogt, %64, %6 : vector<8x16xf32>
    %66 = vector.broadcast %63 : vector<8x1xf32> to vector<8x16xf32>
    %67 = arith.cmpf oeq, %66, %6 : vector<8x16xf32>
    %c5_i32 = arith.constant 5 : i32
    %68 = vector.broadcast %c5_i32 : i32 to vector<8x16xi32>
    %69 = arith.cmpi sgt, %1, %68 : vector<8x16xi32>
    %70 = arith.andi %67, %69 : vector<8x16xi1>
    %71 = arith.ori %65, %70 : vector<8x16xi1>
    %72 = arith.extui %71 : vector<8x16xi1> to vector<8x16xi32>
    %73 = arith.addi %62, %72 : vector<8x16xi32>
    %74 = vector.extract_strided_slice %6 {offsets = [0, 6], sizes = [8, 1], strides = [1, 1]} : vector<8x16xf32> to vector<8x1xf32>
    %75 = vector.broadcast %74 : vector<8x1xf32> to vector<8x16xf32>
    %76 = arith.cmpf ogt, %75, %6 : vector<8x16xf32>
    %77 = vector.broadcast %74 : vector<8x1xf32> to vector<8x16xf32>
    %78 = arith.cmpf oeq, %77, %6 : vector<8x16xf32>
    %c6_i32 = arith.constant 6 : i32
    %79 = vector.broadcast %c6_i32 : i32 to vector<8x16xi32>
    %80 = arith.cmpi sgt, %1, %79 : vector<8x16xi32>
    %81 = arith.andi %78, %80 : vector<8x16xi1>
    %82 = arith.ori %76, %81 : vector<8x16xi1>
    %83 = arith.extui %82 : vector<8x16xi1> to vector<8x16xi32>
    %84 = arith.addi %73, %83 : vector<8x16xi32>
    %85 = vector.extract_strided_slice %6 {offsets = [0, 7], sizes = [8, 1], strides = [1, 1]} : vector<8x16xf32> to vector<8x1xf32>
    %86 = vector.broadcast %85 : vector<8x1xf32> to vector<8x16xf32>
    %87 = arith.cmpf ogt, %86, %6 : vector<8x16xf32>
    %88 = vector.broadcast %85 : vector<8x1xf32> to vector<8x16xf32>
    %89 = arith.cmpf oeq, %88, %6 : vector<8x16xf32>
    %c7_i32 = arith.constant 7 : i32
    %90 = vector.broadcast %c7_i32 : i32 to vector<8x16xi32>
    %91 = arith.cmpi sgt, %1, %90 : vector<8x16xi32>
    %92 = arith.andi %89, %91 : vector<8x16xi1>
    %93 = arith.ori %87, %92 : vector<8x16xi1>
    %94 = arith.extui %93 : vector<8x16xi1> to vector<8x16xi32>
    %95 = arith.addi %84, %94 : vector<8x16xi32>
    %96 = vector.extract_strided_slice %6 {offsets = [0, 8], sizes = [8, 1], strides = [1, 1]} : vector<8x16xf32> to vector<8x1xf32>
    %97 = vector.broadcast %96 : vector<8x1xf32> to vector<8x16xf32>
    %98 = arith.cmpf ogt, %97, %6 : vector<8x16xf32>
    %99 = vector.broadcast %96 : vector<8x1xf32> to vector<8x16xf32>
    %100 = arith.cmpf oeq, %99, %6 : vector<8x16xf32>
    %c8_i32_4 = arith.constant 8 : i32
    %101 = vector.broadcast %c8_i32_4 : i32 to vector<8x16xi32>
    %102 = arith.cmpi sgt, %1, %101 : vector<8x16xi32>
    %103 = arith.andi %100, %102 : vector<8x16xi1>
    %104 = arith.ori %98, %103 : vector<8x16xi1>
    %105 = arith.extui %104 : vector<8x16xi1> to vector<8x16xi32>
    %106 = arith.addi %95, %105 : vector<8x16xi32>
    %107 = vector.extract_strided_slice %6 {offsets = [0, 9], sizes = [8, 1], strides = [1, 1]} : vector<8x16xf32> to vector<8x1xf32>
    %108 = vector.broadcast %107 : vector<8x1xf32> to vector<8x16xf32>
    %109 = arith.cmpf ogt, %108, %6 : vector<8x16xf32>
    %110 = vector.broadcast %107 : vector<8x1xf32> to vector<8x16xf32>
    %111 = arith.cmpf oeq, %110, %6 : vector<8x16xf32>
    %c9_i32 = arith.constant 9 : i32
    %112 = vector.broadcast %c9_i32 : i32 to vector<8x16xi32>
    %113 = arith.cmpi sgt, %1, %112 : vector<8x16xi32>
    %114 = arith.andi %111, %113 : vector<8x16xi1>
    %115 = arith.ori %109, %114 : vector<8x16xi1>
    %116 = arith.extui %115 : vector<8x16xi1> to vector<8x16xi32>
    %117 = arith.addi %106, %116 : vector<8x16xi32>
    %118 = vector.extract_strided_slice %6 {offsets = [0, 10], sizes = [8, 1], strides = [1, 1]} : vector<8x16xf32> to vector<8x1xf32>
    %119 = vector.broadcast %118 : vector<8x1xf32> to vector<8x16xf32>
    %120 = arith.cmpf ogt, %119, %6 : vector<8x16xf32>
    %121 = vector.broadcast %118 : vector<8x1xf32> to vector<8x16xf32>
    %122 = arith.cmpf oeq, %121, %6 : vector<8x16xf32>
    %c10_i32 = arith.constant 10 : i32
    %123 = vector.broadcast %c10_i32 : i32 to vector<8x16xi32>
    %124 = arith.cmpi sgt, %1, %123 : vector<8x16xi32>
    %125 = arith.andi %122, %124 : vector<8x16xi1>
    %126 = arith.ori %120, %125 : vector<8x16xi1>
    %127 = arith.extui %126 : vector<8x16xi1> to vector<8x16xi32>
    %128 = arith.addi %117, %127 : vector<8x16xi32>
    %129 = vector.extract_strided_slice %6 {offsets = [0, 11], sizes = [8, 1], strides = [1, 1]} : vector<8x16xf32> to vector<8x1xf32>
    %130 = vector.broadcast %129 : vector<8x1xf32> to vector<8x16xf32>
    %131 = arith.cmpf ogt, %130, %6 : vector<8x16xf32>
    %132 = vector.broadcast %129 : vector<8x1xf32> to vector<8x16xf32>
    %133 = arith.cmpf oeq, %132, %6 : vector<8x16xf32>
    %c11_i32 = arith.constant 11 : i32
    %134 = vector.broadcast %c11_i32 : i32 to vector<8x16xi32>
    %135 = arith.cmpi sgt, %1, %134 : vector<8x16xi32>
    %136 = arith.andi %133, %135 : vector<8x16xi1>
    %137 = arith.ori %131, %136 : vector<8x16xi1>
    %138 = arith.extui %137 : vector<8x16xi1> to vector<8x16xi32>
    %139 = arith.addi %128, %138 : vector<8x16xi32>
    %140 = vector.extract_strided_slice %6 {offsets = [0, 12], sizes = [8, 1], strides = [1, 1]} : vector<8x16xf32> to vector<8x1xf32>
    %141 = vector.broadcast %140 : vector<8x1xf32> to vector<8x16xf32>
    %142 = arith.cmpf ogt, %141, %6 : vector<8x16xf32>
    %143 = vector.broadcast %140 : vector<8x1xf32> to vector<8x16xf32>
    %144 = arith.cmpf oeq, %143, %6 : vector<8x16xf32>
    %c12_i32 = arith.constant 12 : i32
    %145 = vector.broadcast %c12_i32 : i32 to vector<8x16xi32>
    %146 = arith.cmpi sgt, %1, %145 : vector<8x16xi32>
    %147 = arith.andi %144, %146 : vector<8x16xi1>
    %148 = arith.ori %142, %147 : vector<8x16xi1>
    %149 = arith.extui %148 : vector<8x16xi1> to vector<8x16xi32>
    %150 = arith.addi %139, %149 : vector<8x16xi32>
    %151 = vector.extract_strided_slice %6 {offsets = [0, 13], sizes = [8, 1], strides = [1, 1]} : vector<8x16xf32> to vector<8x1xf32>
    %152 = vector.broadcast %151 : vector<8x1xf32> to vector<8x16xf32>
    %153 = arith.cmpf ogt, %152, %6 : vector<8x16xf32>
    %154 = vector.broadcast %151 : vector<8x1xf32> to vector<8x16xf32>
    %155 = arith.cmpf oeq, %154, %6 : vector<8x16xf32>
    %c13_i32 = arith.constant 13 : i32
    %156 = vector.broadcast %c13_i32 : i32 to vector<8x16xi32>
    %157 = arith.cmpi sgt, %1, %156 : vector<8x16xi32>
    %158 = arith.andi %155, %157 : vector<8x16xi1>
    %159 = arith.ori %153, %158 : vector<8x16xi1>
    %160 = arith.extui %159 : vector<8x16xi1> to vector<8x16xi32>
    %161 = arith.addi %150, %160 : vector<8x16xi32>
    %162 = vector.extract_strided_slice %6 {offsets = [0, 14], sizes = [8, 1], strides = [1, 1]} : vector<8x16xf32> to vector<8x1xf32>
    %163 = vector.broadcast %162 : vector<8x1xf32> to vector<8x16xf32>
    %164 = arith.cmpf ogt, %163, %6 : vector<8x16xf32>
    %165 = vector.broadcast %162 : vector<8x1xf32> to vector<8x16xf32>
    %166 = arith.cmpf oeq, %165, %6 : vector<8x16xf32>
    %c14_i32 = arith.constant 14 : i32
    %167 = vector.broadcast %c14_i32 : i32 to vector<8x16xi32>
    %168 = arith.cmpi sgt, %1, %167 : vector<8x16xi32>
    %169 = arith.andi %166, %168 : vector<8x16xi1>
    %170 = arith.ori %164, %169 : vector<8x16xi1>
    %171 = arith.extui %170 : vector<8x16xi1> to vector<8x16xi32>
    %172 = arith.addi %161, %171 : vector<8x16xi32>
    %173 = vector.extract_strided_slice %6 {offsets = [0, 15], sizes = [8, 1], strides = [1, 1]} : vector<8x16xf32> to vector<8x1xf32>
    %174 = vector.broadcast %173 : vector<8x1xf32> to vector<8x16xf32>
    %175 = arith.cmpf ogt, %174, %6 : vector<8x16xf32>
    %176 = vector.broadcast %173 : vector<8x1xf32> to vector<8x16xf32>
    %177 = arith.cmpf oeq, %176, %6 : vector<8x16xf32>
    %c15_i32 = arith.constant 15 : i32
    %178 = vector.broadcast %c15_i32 : i32 to vector<8x16xi32>
    %179 = arith.cmpi sgt, %1, %178 : vector<8x16xi32>
    %180 = arith.andi %177, %179 : vector<8x16xi1>
    %181 = arith.ori %175, %180 : vector<8x16xi1>
    %182 = arith.extui %181 : vector<8x16xi1> to vector<8x16xi32>
    %183 = arith.addi %172, %182 : vector<8x16xi32>
    %c5_i32_5 = arith.constant 5 : i32
    %184 = vector.broadcast %c5_i32_5 : i32 to vector<8x16xi32>
    %185 = arith.cmpi slt, %183, %184 : vector<8x16xi32>
    %c5_i32_6 = arith.constant 5 : i32
    %186 = vector.broadcast %c5_i32_6 : i32 to vector<8x16xi32>
    %187 = arith.cmpi sge, %183, %186 : vector<8x16xi32>
    %c10_i32_7 = arith.constant 10 : i32
    %188 = vector.broadcast %c10_i32_7 : i32 to vector<8x16xi32>
    %189 = arith.cmpi slt, %183, %188 : vector<8x16xi32>
    %190 = arith.andi %187, %189 : vector<8x16xi1>
    %cst_8 = arith.constant dense<0xFF800000> : vector<8xf32>
    %191 = vector.multi_reduction <maximumf>, %6, %cst_8 [1] : vector<8x16xf32> to vector<8xf32>
    %192 = vector.shape_cast %191 : vector<8xf32> to vector<8x1xf32>
    %193 = vector.broadcast %192 : vector<8x1xf32> to vector<8x16xf32>
    %194 = arith.subf %6, %193 : vector<8x16xf32>
    %195 = math.exp %194 : vector<8x16xf32>
    %cst_9 = arith.constant dense<0.000000e+00> : vector<8xf32>
    %196 = vector.multi_reduction <add>, %195, %cst_9 [1] : vector<8x16xf32> to vector<8xf32>
    %197 = vector.shape_cast %196 : vector<8xf32> to vector<8x1xf32>
    %198 = tpu.reciprocal %197 {approx = true} : vector<8x1xf32> -> vector<8x1xf32>
    %199 = vector.broadcast %198 : vector<8x1xf32> to vector<8x16xf32>
    %200 = arith.mulf %195, %199 : vector<8x16xf32>
    %201 = math.exp %200 : vector<8x16xf32>
    %cst_10 = arith.constant 0.000000e+00 : f32
    %202 = vector.broadcast %cst_10 : f32 to vector<8x16xf32>
    %203 = arith.select %185, %201, %202 : vector<8x16xi1>, vector<8x16xf32>
    %cst_11 = arith.constant 0.000000e+00 : f32
    %204 = vector.broadcast %cst_11 : f32 to vector<8x16xf32>
    %205 = arith.select %190, %201, %204 : vector<8x16xi1>, vector<8x16xf32>
    %cst_12 = arith.constant dense<0.000000e+00> : vector<8xf32>
    %206 = vector.multi_reduction <add>, %203, %cst_12 [1] : vector<8x16xf32> to vector<8xf32>
    %207 = vector.shape_cast %206 : vector<8xf32> to vector<8x1xf32>
    %208 = tpu.reciprocal %207 {approx = true} : vector<8x1xf32> -> vector<8x1xf32>
    %cst_13 = arith.constant 5.000000e-01 : f32
    %209 = vector.broadcast %cst_13 : f32 to vector<8x1xf32>
    %210 = arith.mulf %209, %208 : vector<8x1xf32>
    %211 = vector.broadcast %210 : vector<8x1xf32> to vector<8x16xf32>
    %212 = arith.mulf %203, %211 : vector<8x16xf32>
    %cst_14 = arith.constant dense<0.000000e+00> : vector<8xf32>
    %213 = vector.multi_reduction <add>, %205, %cst_14 [1] : vector<8x16xf32> to vector<8xf32>
    %214 = vector.shape_cast %213 : vector<8xf32> to vector<8x1xf32>
    %215 = tpu.reciprocal %214 {approx = true} : vector<8x1xf32> -> vector<8x1xf32>
    %cst_15 = arith.constant 9.900000e-01 : f32
    %216 = vector.broadcast %cst_15 : f32 to vector<8x1xf32>
    %217 = arith.mulf %216, %215 : vector<8x1xf32>
    %218 = vector.broadcast %217 : vector<8x1xf32> to vector<8x16xf32>
    %219 = arith.mulf %205, %218 : vector<8x16xf32>
    %cst_16 = arith.constant dense<0.000000e+00> : vector<8x32xf32>
    %220 = tpu.matmul %212, %0, %cst_16 {dimension_numbers = #tpu.dot_dimension_numbers<[1], [0], [0], [1], [0, 0, 1, 1], [], []>} : vector<8x16xf32>, vector<16x32xf32>, vector<8x32xf32> -> vector<8x32xf32>
    %cst_17 = arith.constant dense<0.000000e+00> : vector<8x32xf32>
    %221 = tpu.matmul %219, %0, %cst_17 {dimension_numbers = #tpu.dot_dimension_numbers<[1], [0], [0], [1], [0, 0, 1, 1], [], []>} : vector<8x16xf32>, vector<16x32xf32>, vector<8x32xf32> -> vector<8x32xf32>
    %cst_18 = arith.constant 5.000000e-01 : f32
    %222 = vector.broadcast %cst_18 : f32 to vector<8x32xf32>
    %223 = arith.mulf %222, %5 : vector<8x32xf32>
    %224 = arith.addf %223, %220 : vector<8x32xf32>
    %225 = arith.index_cast %3 : i32 to index
    %c0_19 = arith.constant 0 : index
    %226 = vector.load %arg3[%225, %c0_19] : memref<8x32xf32, #tpu.memory_space<vmem>>, vector<8x32xf32>
    tpu.vector_store %arg3[%225, %c0_19], %224 {strides = array<i32>} : memref<8x32xf32, #tpu.memory_space<vmem>>, vector<8x32xf32>,
    %cst_20 = arith.constant 0.00999999977 : f32
    %227 = vector.broadcast %cst_20 : f32 to vector<8x32xf32>
    %228 = arith.mulf %227, %5 : vector<8x32xf32>
    %229 = arith.addf %228, %221 : vector<8x32xf32>
    %230 = arith.index_cast %3 : i32 to index
    %c0_21 = arith.constant 0 : index
    %231 = vector.load %arg4[%230, %c0_21] : memref<8x32xf32, #tpu.memory_space<vmem>>, vector<8x32xf32>
    tpu.vector_store %arg4[%230, %c0_21], %229 {strides = array<i32>} : memref<8x32xf32, #tpu.memory_space<vmem>>, vector<8x32xf32>,
    %c1_i32_22 = arith.constant 1 : i32
    return
  }
  func.func @transform_0(%arg0: i32) -> (i32, i32) {
    %c0_i32 = arith.constant 0 : i32
    %c0_i32_0 = arith.constant 0 : i32
    return %arg0, %c0_i32 : i32, i32
  }
  func.func @transform_1(%arg0: i32) -> (i32, i32) {
    %c0_i32 = arith.constant 0 : i32
    %c0_i32_0 = arith.constant 0 : i32
    %c0_i32_1 = arith.constant 0 : i32
    return %c0_i32, %c0_i32_0 : i32, i32
  }
  func.func @transform_2(%arg0: i32) -> (i32, i32) {
    %c0_i32 = arith.constant 0 : i32
    %c0_i32_0 = arith.constant 0 : i32
    return %arg0, %c0_i32 : i32, i32
  }
  func.func @transform_3(%arg0: i32) -> (i32, i32) {
    %c0_i32 = arith.constant 0 : i32
    %c0_i32_0 = arith.constant 0 : i32
    return %arg0, %c0_i32 : i32, i32
  }
}

</mosaic_0001>

<bundles_post_ra>
// kernel: tpu_custom_call.1
= control target key start
LH: loop header
LB: loop body
LE: loop exit
PB: predicated region body
PF: predicated region fallthrough
CT: control target
= control target key end

     0   :  { %9 = vsyncpa [#allocation3], 0  ;;  %s879_s0 = inlined_call_operand.hbm [shape: f32[8,32], index: 0, kind: input, shape index: {}]   ;;  %s880_s1 = inlined_call_operand.hbm [shape: f32[16,32], index: 1, kind: input, shape index: {}]   ;;  %s881_s2 = inlined_call_operand.hbm [shape: f32[8,32], index: 2, kind: output, shape index: {0}]   ;;  %s882_s3 = inlined_call_operand.hbm [shape: f32[8,32], index: 3, kind: output, shape index: {1}]  }
   0x1   :  { %10 = vsyncpa [#allocation6], 0 }
   0x2   :  { %11 = vsyncpa [#allocation4], 0 }
   0x3   :  { %12 = vsyncpa [#allocation9], 0  ;;  %s690_s12 = smov [#allocation2]   ;;  %s691_s14 = smov [#allocation5]  }
   0x4   :  { %s19_s13 = sshll.u32 %s690_s12, 4  ;;  %s28_s15 = sshll.u32 %s691_s14, 4  ;;  %s20_s13 = int_to_ptr.vmem [resolvable:$true] %s19_s13  ;;  %s29_s15 = int_to_ptr.vmem [resolvable:$true] %s28_s15 }
   0x5   :  { %s610_s16 = scalar_lea.vmem %s20_s13, 128  ;;  %p615_p1 = scmp.lt.s32.totalorder %s20_s13, %s20_s13 }
   0x6   :  { %p611_p0 = scmp.ne.s32.totalorder %s20_s13, %s610_s16  ;;  %p616_p2 = scmp.lt.s32.totalorder %s610_s16, %s610_s16 }
   0x8   :  { %p617_p3 = por %p616_p2, %p615_p1 }
   0xa   :  { %p618_p4 = pnand %p617_p3, %p611_p0 }
   0xc   :  { %621 = shalt.err (!%p618_p4)
}
   0xd   :  { %22 = dma.hbm_to_vmem [thread:$0]  %s879_s0, 128, %s20_s13, [#allocation3]  }
   0xe   :  { %s630_s19 = scalar_lea.vmem %s29_s15, 256  ;;  %p635_p6 = scmp.lt.s32.totalorder %s29_s15, %s29_s15 }
   0xf   :  { %p631_p5 = scmp.ne.s32.totalorder %s29_s15, %s630_s19  ;;  %p636_p7 = scmp.lt.s32.totalorder %s630_s19, %s630_s19 }
  0x11   :  { %p637_p8 = por %p636_p7, %p635_p6 }
  0x13   :  { %p638_p9 = pnand %p637_p8, %p631_p5 }
  0x15   :  { %641 = shalt.err (!%p638_p9)
}
  0x16   :  { %s692_s20 = smov 128   ;;  %s693_s21 = smov 8  }
  0x17   :  { %34 = dma.hbm_to_vmem [thread:$0]  %s880_s1, 256, %s29_s15, [#allocation6], %s692_s20, %s692_s20, %s693_s21  }
  0x18   :  { %682 = dma.done.wait [#allocation3], 128  }
  0x19   :  { %683 = vsyncadd [#allocation3], 4294967168 }
  0x1a   :  { %684 = dma.done.wait [#allocation6], 256  }
  0x1b   :  { %685 = vsyncadd [#allocation6], 4294967040  ;;  %v694_v0 = vmov 0.0   ;;  %vm884_vm0 = vmmov 0   ;;  %v696_v1 = vmov 0   ;;  %vm883_vm1 = vcmask 261120  }
  0x1c   :  { %530 = vmatprep.subr.mxu0 %v694_v0  ;;  %534 = vmatprep.mubr.msk.f32.mxu0 %vm884_vm0, %v694_v0  ;;  %v747_v2 = vld [vmem:[#allocation5 + $0x8] sm:$0xff]  ;;  %v753_v3 = vld [vmem:[#allocation5] sm:$0xff]  ;;  %v760_v4 = vld [vmem:[#allocation2] sm:$0xff]  ;;  %v697_v5 = vmov 2   ;;  %vm885_vm2 = vcmask 130048   ;;  %v698_v9 = vmov 1   ;;  %v43_v34 = vlaneseq }
  0x1d   :  { %575 = vset.pattern.permute.xlu1 %v696_v1  ;;  %537 = vmatprep.subr.mxu1 %v694_v0  ;;  %v699_v10 = vmov 3   ;;  %v700_v11 = vmov 4   ;;  %v701_v12 = vmov 5   ;;  %v702_v13 = vmov 6   ;;  %s712_s0 = smov [#allocation7]   ;;  %s713_s24 = smov [#allocation8]  }
  0x1e   :  { %541 = vmatprep.mubr.msk.f32.mxu1 %vm884_vm0, %v694_v0  ;;  %531 = vmatpush3.xpose.msk.msra.mxu0 %vm883_vm1, %v747_v2  ;;  %v703_v14 = vmov 7   ;;  %v704_v15 = vmov 8   ;;  %v705_v16 = vmov 9   ;;  %v706_v17 = vmov 10   ;;  %s492_s1 = sshll.u32 %s712_s0, 4  ;;  %s502_s25 = sshll.u32 %s713_s24, 4  ;;  %s493_s1 = int_to_ptr.vmem [resolvable:$true] %s492_s1  ;;  %s503_s25 = int_to_ptr.vmem [resolvable:$true] %s502_s25 }
  0x1f   :  { %538 = vmatpush3.msra.mxu1 %v747_v2  ;;  %532 = vmatprep.subr.mxu0 %v694_v0  ;;  %v707_v18 = vmov 11   ;;  %v708_v19 = vmov 14   ;;  %v709_v20 = vmov 12   ;;  %v710_v21 = vmov 13   ;;  %s642_s26 = scalar_lea.vmem %s493_s1, 128  ;;  %p647_p11 = scmp.lt.s32.totalorder %s493_s1, %s493_s1 }
  0x20   :  { %539 = vmatprep.subr.mxu1 %v694_v0  ;;  %577 = vset.pattern.permute.xlu0 %v697_v5  ;;  %v711_v22 = vmov 15   ;;  %v789_v35 = vand.u32 127, %v43_v34  ;;  %v480_v34 = vmul.f32 0.5, %v760_v4  ;;  %p643_p10 = scmp.ne.s32.totalorder %s493_s1, %s642_s26  ;;  %p648_p12 = scmp.lt.s32.totalorder %s642_s26, %s642_s26 }
  0x21   :  { %540 = vmatpush3.msra.mxu1 %v753_v3 }
  0x22   :  { %544 = vmatprep.subr.mxu1 %v694_v0  ;;  %533 = vmatpush3.xpose.msk.msra.mxu0 %vm883_vm1, %v753_v3  ;;  %vm143_vm3 = vcmp.gt.s32.totalorder %v789_v35, 1  ;;  %vm133_vm5 = vcmp.gt.s32.totalorder %v789_v35, 0  ;;  %vm154_vm7 = vcmp.gt.s32.totalorder %v789_v35, 2  ;;  %vm165_vm0 = vcmp.gt.s32.totalorder %v789_v35, 3  ;;  %p649_p13 = por %p648_p12, %p647_p11 }
  0x24   :  { %p650_p0 = pnand %p649_p13, %p643_p10 }
  0x25   :  { %535 = vmatmul.mubr.msk.f32.vlgmr.msra.gmra.mxu0 %vm883_vm1, %v760_v4 }
  0xe5   :  { %v764_v6 = vpop.f32.mrf.mxu0 }
  0xe6   :  { %128 = vperm.xlu1 %575, %v764_v6   ;;  %v307_v7 = vsel %vm885_vm2, %v764_v6, -inf }
  0xe7   :  { %308 = vmax.xlane.f32.xlu0 %v307_v7  ;;  %v536_v8 = vpop.f32.mrf.mxu0 }
  0xea   :  { %576 = vset.pattern.permute.xlu1 %v698_v9 }
  0xeb   :  { %138 = vperm.xlu1 %576, %v764_v6  }
  0xef   :  { %578 = vset.pattern.permute.xlu1 %v699_v10 }
  0xf0   :  { %160 = vperm.xlu1 %578, %v764_v6  }
  0xf4   :  { %579 = vset.pattern.permute.xlu1 %v700_v11 }
  0xf5   :  { %171 = vperm.xlu1 %579, %v764_v6  }
  0xf9   :  { %580 = vset.pattern.permute.xlu1 %v701_v12 }
  0xfa   :  { %182 = vperm.xlu1 %580, %v764_v6  }
  0xfd   :  { %149 = vperm.xlu0 %577, %v764_v6  }
  0xfe   :  { %581 = vset.pattern.permute.xlu1 %v702_v13 }
  0xff   :  { %193 = vperm.xlu1 %581, %v764_v6  }
 0x101   :  { %589 = vset.pattern.permute.xlu0 %v708_v19 }
 0x103   :  { %582 = vset.pattern.permute.xlu1 %v703_v14 }
 0x104   :  { %204 = vperm.xlu1 %582, %v764_v6  }
 0x108   :  { %583 = vset.pattern.permute.xlu1 %v704_v15 }
 0x109   :  { %215 = vperm.xlu1 %583, %v764_v6  }
 0x10d   :  { %584 = vset.pattern.permute.xlu1 %v705_v16 }
 0x10e   :  { %226 = vperm.xlu1 %584, %v764_v6  }
 0x112   :  { %585 = vset.pattern.permute.xlu1 %v706_v17 }
 0x113   :  { %237 = vperm.xlu1 %585, %v764_v6  }
 0x117   :  { %586 = vset.pattern.permute.xlu1 %v707_v18 }
 0x118   :  { %248 = vperm.xlu1 %586, %v764_v6  }
 0x11c   :  { %587 = vset.pattern.permute.xlu1 %v709_v20 }
 0x11d   :  { %259 = vperm.xlu1 %587, %v764_v6  }
 0x121   :  { %588 = vset.pattern.permute.xlu1 %v710_v21 }
 0x122   :  { %270 = vperm.xlu1 %588, %v764_v6  }
 0x126   :  { %590 = vset.pattern.permute.xlu1 %v711_v22 }
 0x127   :  { %292 = vperm.xlu1 %590, %v764_v6  }
 0x161   :  { %v129_v28 = vpop.permute.xlu1 %128 }
 0x162   :  { %vm132_vm6 = vcmp.eq.f32.partialorder %v129_v28, %v764_v6  ;;  %vm131_vm11 = vcmp.gt.f32.partialorder %v129_v28, %v764_v6 }
 0x163   :  { %vm134_vm12 = vmand %vm132_vm6, %vm133_vm5  ;;  %vm176_vm6 = vcmp.gt.s32.totalorder %v789_v35, 4 }
 0x164   :  { %vm135_vm1 = vmor %vm131_vm11, %vm134_vm12  ;;  %vm187_vm11 = vcmp.gt.s32.totalorder %v789_v35, 5 }
 0x165   :  { %v136_v41 = vsel %vm135_vm1, 1, %v696_v1 }
 0x166   :  { %v139_v29 = vpop.permute.xlu1 %138 }
 0x167   :  { %vm142_vm4 = vcmp.eq.f32.partialorder %v139_v29, %v764_v6  ;;  %vm141_vm9 = vcmp.gt.f32.partialorder %v139_v29, %v764_v6 }
 0x168   :  { %vm144_vm10 = vmand %vm142_vm4, %vm143_vm3 }
 0x169   :  { %vm145_vm15 = vmor %vm141_vm9, %vm144_vm10 }
 0x16a   :  { %v146_v39 = vsel %vm145_vm15, 1, %v696_v1 }
 0x16b   :  { %v161_v30 = vpop.permute.xlu1 %160  ;;  %v147_v43 = vadd.s32 %v146_v39, %v136_v41 }
 0x16c   :  { %vm163_vm4 = vcmp.gt.f32.partialorder %v161_v30, %v764_v6 }
 0x170   :  { %v309_v23 = vpop.xlane.xlu0 %308  ;;  %v172_v31 = vpop.permute.xlu1 %171 }
 0x171   :  { %v310_v24 = vsub.f32 %v764_v6, %v309_v23  ;;  %vm174_vm9 = vcmp.gt.f32.partialorder %v172_v31, %v764_v6 }
 0x173   :  { %v311_v25 = vmul.f32 1.442695, %v310_v24 }
 0x175   :  { %592 = vpow2.f32 %v311_v25  ;;  %v183_v32 = vpop.permute.xlu1 %182 }
 0x176   :  { %vm186_vm1 = vcmp.eq.f32.partialorder %v183_v32, %v764_v6 }
 0x177   :  { %vm188_vm12 = vmand %vm186_vm1, %vm187_vm11  ;;  %vm231_vm1 = vcmp.gt.s32.totalorder %v789_v35, 9 }
 0x178   :  { %v150_v37 = vpop.permute.xlu0 %149 }
 0x179   :  { %vm153_vm8 = vcmp.eq.f32.partialorder %v150_v37, %v764_v6  ;;  %vm152_vm13 = vcmp.gt.f32.partialorder %v150_v37, %v764_v6  ;;  %v483_v37 = vmul.f32 0.01, %v760_v4 }
 0x17a   :  { %v194_v33 = vpop.permute.xlu1 %193  ;;  %vm155_vm14 = vmand %vm153_vm8, %vm154_vm7  ;;  %vm175_vm7 = vcmp.eq.f32.partialorder %v172_v31, %v764_v6 }
 0x17b   :  { %vm156_vm3 = vmor %vm152_vm13, %vm155_vm14  ;;  %vm198_vm13 = vcmp.gt.s32.totalorder %v789_v35, 6  ;;  %vm197_vm14 = vcmp.eq.f32.partialorder %v194_v33, %v764_v6 }
 0x17c   :  { %v157_v42 = vsel %vm156_vm3, 1, %v696_v1  ;;  %vm177_vm10 = vmand %vm175_vm7, %vm176_vm6  ;;  %vm196_vm3 = vcmp.gt.f32.partialorder %v194_v33, %v764_v6 }
 0x17d   :  { %v158_v44 = vadd.s32 %v157_v42, %v147_v43 }
 0x17f   :  { %v791_v36 = vpop.permute.xlu1 %204 }
 0x180   :  { %vm208_vm6 = vcmp.eq.f32.partialorder %v791_v36, %v764_v6 }
 0x182   :  { %v784_v26 = vpop.eup %592 }
 0x183   :  { %v313_v27 = vsel %vm885_vm2, %v784_v26, 0.0  ;;  %vm164_vm2 = vcmp.eq.f32.partialorder %v161_v30, %v764_v6 }
 0x184   :  { %314 = vadd.xlane.f32.xlu0 %v313_v27  ;;  %v216_v38 = vpop.permute.xlu1 %215  ;;  %vm166_vm5 = vmand %vm164_vm2, %vm165_vm0  ;;  %vm185_vm2 = vcmp.gt.f32.partialorder %v183_v32, %v764_v6 }
 0x185   :  { %vm167_vm8 = vmor %vm163_vm4, %vm166_vm5  ;;  %vm209_vm5 = vcmp.gt.s32.totalorder %v789_v35, 7 }
 0x186   :  { %v168_v46 = vsel %vm167_vm8, 1, %v696_v1  ;;  %vm178_vm0 = vmor %vm174_vm9, %vm177_vm10  ;;  %vm220_vm8 = vcmp.gt.s32.totalorder %v789_v35, 8  ;;  %vm219_vm9 = vcmp.eq.f32.partialorder %v216_v38, %v764_v6  ;;  %vm207_vm10 = vcmp.gt.f32.partialorder %v791_v36, %v764_v6 }
 0x187   :  { %v169_v47 = vadd.s32 %v168_v46, %v158_v44  ;;  %v179_v48 = vsel %vm178_vm0, 1, %v696_v1  ;;  %vm189_vm15 = vmor %vm185_vm2, %vm188_vm12  ;;  %vm218_vm2 = vcmp.gt.f32.partialorder %v216_v38, %v764_v6 }
 0x188   :  { %vm199_vm4 = vmand %vm197_vm14, %vm198_vm13  ;;  %v190_v51 = vsel %vm189_vm15, 1, %v696_v1  ;;  %vm242_vm14 = vcmp.gt.s32.totalorder %v789_v35, 10 }
 0x189   :  { %v227_v40 = vpop.permute.xlu1 %226  ;;  %v180_v50 = vadd.s32 %v179_v48, %v169_v47  ;;  %vm200_vm7 = vmor %vm196_vm3, %vm199_vm4 }
 0x18a   :  { %vm210_vm11 = vmand %vm208_vm6, %vm209_vm5  ;;  %vm230_vm0 = vcmp.eq.f32.partialorder %v227_v40, %v764_v6  ;;  %v201_v54 = vsel %vm200_vm7, 1, %v696_v1  ;;  %vm229_vm3 = vcmp.gt.f32.partialorder %v227_v40, %v764_v6  ;;  %vm253_vm6 = vcmp.gt.s32.totalorder %v789_v35, 11 }
 0x18b   :  { %v191_v52 = vadd.s32 %v190_v51, %v180_v50  ;;  %vm221_vm12 = vmand %vm219_vm9, %vm220_vm8 }
 0x18c   :  { %vm211_vm13 = vmor %vm207_vm10, %vm210_vm11  ;;  %vm264_vm11 = vcmp.gt.s32.totalorder %v789_v35, 12 }
 0x18d   :  { %v202_v56 = vadd.s32 %v201_v54, %v191_v52  ;;  %vm232_vm4 = vmand %vm230_vm0, %vm231_vm1  ;;  %v212_v57 = vsel %vm211_vm13, 1, %v696_v1  ;;  %vm275_vm13 = vcmp.gt.s32.totalorder %v789_v35, 13 }
 0x18e   :  { %v238_v45 = vpop.permute.xlu1 %237  ;;  %vm222_vm5 = vmor %vm218_vm2, %vm221_vm12 }
 0x18f   :  { %vm241_vm15 = vcmp.eq.f32.partialorder %v238_v45, %v764_v6  ;;  %vm240_vm8 = vcmp.gt.f32.partialorder %v238_v45, %v764_v6  ;;  %v213_v59 = vadd.s32 %v212_v57, %v202_v56  ;;  %vm233_vm10 = vmor %vm229_vm3, %vm232_vm4  ;;  %v223_v60 = vsel %vm222_vm5, 1, %v696_v1 }
 0x190   :  { %vm243_vm9 = vmand %vm241_vm15, %vm242_vm14  ;;  %v234_v61 = vsel %vm233_vm10, 1, %v696_v1  ;;  %vm286_vm5 = vcmp.gt.s32.totalorder %v789_v35, 14 }
 0x191   :  { %vm244_vm12 = vmor %vm240_vm8, %vm243_vm9  ;;  %v224_v63 = vadd.s32 %v223_v60, %v213_v59 }
 0x192   :  { %v245_v5 = vsel %vm244_vm12, 1, %v696_v1 }
 0x193   :  { %v249_v49 = vpop.permute.xlu1 %248  ;;  %v235_v7 = vadd.s32 %v234_v61, %v224_v63 }
 0x194   :  { %vm252_vm7 = vcmp.eq.f32.partialorder %v249_v49, %v764_v6  ;;  %vm251_vm1 = vcmp.gt.f32.partialorder %v249_v49, %v764_v6 }
 0x195   :  { %vm254_vm2 = vmand %vm252_vm7, %vm253_vm6  ;;  %v246_v10 = vadd.s32 %v245_v5, %v235_v7 }
 0x196   :  { %vm255_vm4 = vmor %vm251_vm1, %vm254_vm2  ;;  %vm297_vm1 = vcmp.gt.s32.totalorder %v789_v35, 15 }
 0x197   :  { %v256_v8 = vsel %vm255_vm4, 1, %v696_v1 }
 0x198   :  { %v260_v53 = vpop.permute.xlu1 %259  ;;  %v257_v13 = vadd.s32 %v256_v8, %v246_v10 }
 0x199   :  { %vm263_vm0 = vcmp.eq.f32.partialorder %v260_v53, %v764_v6  ;;  %vm262_vm15 = vcmp.gt.f32.partialorder %v260_v53, %v764_v6 }
 0x19a   :  { %281 = vperm.xlu0 %589, %v764_v6   ;;  %vm265_vm3 = vmand %vm263_vm0, %vm264_vm11 }
 0x19b   :  { %vm266_vm9 = vmor %vm262_vm15, %vm265_vm3 }
 0x19c   :  { %v267_v12 = vsel %vm266_vm9, 1, %v696_v1 }
 0x19d   :  { %v271_v58 = vpop.permute.xlu1 %270  ;;  %v268_v16 = vadd.s32 %v267_v12, %v257_v13 }
 0x19e   :  { %591 = vset.pattern.permute.xlu0 %v711_v22  ;;  %vm274_vm14 = vcmp.eq.f32.partialorder %v271_v58, %v764_v6  ;;  %vm273_vm7 = vcmp.gt.f32.partialorder %v271_v58, %v764_v6 }
 0x19f   :  { %vm276_vm8 = vmand %vm274_vm14, %vm275_vm13 }
 0x1a0   :  { %vm277_vm0 = vmor %vm273_vm7, %vm276_vm8  ;;  %vm886_vm7 = vcmask 130048  }
 0x1a1   :  { %v278_v15 = vsel %vm277_vm0, 1, %v696_v1  ;;  %vm887_vm8 = vmmov %vm886_vm7  ;;  %vm891_vm0 = vcmask 261120  }
 0x1a2   :  { %v293_v9 = vpop.permute.xlu1 %292  ;;  %v279_v19 = vadd.s32 %v278_v15, %v268_v16  ;;  %vm888_vm9 = vmmov %vm886_vm7 }
 0x1a3   :  { %vm296_vm2 = vcmp.eq.f32.partialorder %v293_v9, %v764_v6  ;;  %vm295_vm13 = vcmp.gt.f32.partialorder %v293_v9, %v764_v6 }
 0x1a4   :  { %vm298_vm14 = vmand %vm296_vm2, %vm297_vm1 }
 0x1a5   :  { %vm299_vm15 = vmor %vm295_vm13, %vm298_vm14 }
 0x1a6   :  { %v300_v21 = vsel %vm299_vm15, 1, %v696_v1 }
 0x20d   :  { %v315_v55 = vpop.xlane.xlu0 %314 }
 0x20e   :  { %594 = vrcp.f32 %v315_v55 }
 0x215   :  { %v282_v62 = vpop.permute.xlu0 %281 }
 0x216   :  { %vm285_vm6 = vcmp.eq.f32.partialorder %v282_v62, %v764_v6  ;;  %vm284_vm10 = vcmp.gt.f32.partialorder %v282_v62, %v764_v6 }
 0x217   :  { %vm287_vm11 = vmand %vm285_vm6, %vm286_vm5 }
 0x218   :  { %vm288_vm12 = vmor %vm284_vm10, %vm287_vm11  ;;  %vm889_vm10 = vmmov 0  }
 0x219   :  { %v289_v18 = vsel %vm288_vm12, 1, %v696_v1  ;;  %vm890_vm11 = vmmov %vm886_vm7 }
 0x21a   :  { %v290_v20 = vadd.s32 %v289_v18, %v279_v19 }
 0x21b   :  { %v595_v11 = vpop.eup %594 }
 0x21c   :  { %v317_v14 = vmul.f32 %v595_v11, %v784_v26  ;;  %v301_v22 = vadd.s32 %v300_v21, %v290_v20 }
 0x21e   :  { %v318_v17 = vmul.f32 1.442695, %v317_v14  ;;  %vm303_vm3 = vcmp.ge.s32.totalorder %v301_v22, 5  ;;  %vm304_vm4 = vcmp.lt.s32.totalorder %v301_v22, 10  ;;  %vm302_vm6 = vcmp.lt.s32.totalorder %v301_v22, 5 }
 0x21f   :  { %vm305_vm5 = vmand %vm303_vm3, %vm304_vm4 }
 0x220   :  { %596 = vpow2.f32 %v318_v17 }
 0x22d   :  { %v597_v23 = vpop.eup %596 }
 0x22e   :  { %v321_v24 = vsel %vm305_vm5, %v597_v23, 0.0  ;;  %v320_v25 = vsel %vm302_vm6, %v597_v23, 0.0 }
 0x22f   :  { %v328_v26 = vsel %vm886_vm7, %v321_v24, 0.0  ;;  %v322_v6 = vsel %vm887_vm8, %v320_v25, 0.0 }
 0x230   :  { %329 = vadd.xlane.f32.xlu0 %v328_v26  ;;  %323 = vadd.xlane.f32.xlu1 %v322_v6 }
 0x2b9   :  { %v330_v27 = vpop.xlane.xlu0 %329  ;;  %v324_v28 = vpop.xlane.xlu1 %323 }
 0x2ba   :  { %598 = vrcp.f32 %v330_v27 }
 0x2bb   :  { %600 = vrcp.f32 %v324_v28 }
 0x2c7   :  { %v599_v29 = vpop.eup %598 }
 0x2c8   :  { %v601_v1 = vpop.eup %600  ;;  %v332_v31 = vmul.f32 0.99, %v599_v29 }
 0x2c9   :  { %v326_v30 = vmul.f32 0.5, %v601_v1 }
 0x2ca   :  { %v333_v33 = vmul.f32 %v332_v31, %v321_v24 }
 0x2cb   :  { %v327_v32 = vmul.f32 %v326_v30, %v320_v25 }
 0x2cd   :  { %542 = vmatmul.mubr.msk.f32.vlgmr.msra.gmra.mxu1 %vm888_vm9, %v327_v32 }
 0x2ce   :  { %545 = vmatpush3.msra.mxu1 %v747_v2  ;;  %548 = vmatprep.mubr.msk.f32.mxu1 %vm889_vm10, %v694_v0 }
 0x2cf   :  { %546 = vmatprep.subr.mxu1 %v694_v0 }
 0x2d0   :  { %547 = vmatpush3.msra.mxu1 %v753_v3 }
 0x2d1   :  { %549 = vmatmul.mubr.msk.f32.vlgmr.msra.gmra.mxu1 %vm890_vm11, %v333_v33 }
 0x38d   :  { %v403_v35 = vpop.f32.mrf.mxu1 }
 0x38e   :  { %v481_v36 = vadd.f32 %v480_v34, %v403_v35 }
 0x38f   :  { %v543_v2 = vpop.f32.mrf.mxu1 }
 0x390   :  { %482 = vst.msk [vmem:[#allocation7] sm:$0xff] %vm891_vm0, %v481_v36 }
 0x391   :  { %v476_v38 = vpop.f32.mrf.mxu1 }
 0x392   :  { %653 = shalt.err (!%p650_p0)
}
 0x393   :  { %495 = dma.vmem_to_hbm [thread:$0]  %s493_s1, 128, %s881_s2, [#allocation4]   ;;  %v484_v0 = vadd.f32 %v483_v37, %v476_v38  ;;  %v550_v3 = vpop.f32.mrf.mxu1  ;;  %vm892_vm1 = vmmov %vm891_vm0 }
 0x394   :  { %s662_s29 = scalar_lea.vmem %s503_s25, 128  ;;  %p667_p2 = scmp.lt.s32.totalorder %s503_s25, %s503_s25 }
 0x395   :  { %485 = vst.msk [vmem:[#allocation8] sm:$0xff] %vm892_vm1, %v484_v0  ;;  %p663_p1 = scmp.ne.s32.totalorder %s503_s25, %s662_s29  ;;  %p668_p3 = scmp.lt.s32.totalorder %s662_s29, %s662_s29 }
 0x397   :  { %p669_p4 = por %p668_p3, %p667_p2 }
 0x399   :  { %p670_p5 = pnand %p669_p4, %p663_p1 }
 0x39b   :  { %673 = shalt.err (!%p670_p5)
}
 0x39c   :  { %505 = dma.vmem_to_hbm [thread:$0]  %s503_s25, 128, %s882_s3, [#allocation9]  }
 0x39d   :  { %686 = dma.done.wait [#allocation4], 128  }
 0x39e   :  { %687 = vsyncadd [#allocation4], 4294967168 }
 0x39f   :  { %688 = dma.done.wait [#allocation9], 128  }
 0x3a0   :  { %689 = vsyncadd [#allocation9], 4294967168 }
 0x3a1   :  { %512 = vsyncpa [#allocation3], 1 }
 0x3a2   :  { %513 = vsyncpa [#allocation6], 1 }
 0x3a3   :  { %514 = vsyncpa [#allocation4], 1 }
 0x3a4   :  { %515 = vsyncpa [#allocation9], 1 }

</bundles_post_ra>
